<compile_context>
chip_gen: v5e
topology: v5e:2x2
jax: 0.10.0
libtpu: 0.0.40
codegen_flags: <defaults>
</compile_context>

<pallas_src>
import functools
import math

import jax
import jax.numpy as jnp
from jax.experimental import pallas as pl
from jax.experimental.pallas import tpu as pltpu

_LANE = 128
_SUBLANE = 8
_DEFAULT_BLOCK_BUDGET = 6 * 1024 * 1024   # bytes per (input|output) buffer
_MIN_BLOCK_BYTES = 512 * 1024             # keep blocks big enough to pipeline well
_VMEM_SLACK = 4 * 1024 * 1024             # headroom for Mosaic internal scratch


def _cdiv(a: int, b: int) -> int:
    return -(-a // b)


def _elem_bytes_for_budget(dtype) -> int:
    """Bytes/element used for VMEM block sizing.

    VMEM tiles are stored in the input dtype, so use itemsize — except on
    v5-class (and older) chips, where sub-32-bit values widen to f32 in vregs
    (no bf16 VPU), so keep a 4 B/elem allowance there.
    """
    itemsize = jnp.dtype(dtype).itemsize
    if itemsize >= 4:
        return itemsize
    try:
        kind = jax.devices()[0].device_kind.lower()
    except Exception:  # pragma: no cover - defensive
        kind = ""
    old_gen = (not kind) or any(v in kind for v in ("v2", "v3", "v4", "v5"))
    return 4 if old_gen else itemsize


def _compiler_params(step_bytes: int, dimension_semantics):
    # Double-buffered (in + out) blocks plus slack; clamp so it stays well
    # inside every generation's physical VMEM (v7x only has 64 MiB).
    vmem_limit = int(min(28 * 1024 * 1024,
                         max(16 * 1024 * 1024, 2 * step_bytes + _VMEM_SLACK)))
    return pltpu.CompilerParams(
        dimension_semantics=dimension_semantics,
        vmem_limit_bytes=vmem_limit,
    )


def _fused_kernel(x_ref, o_ref, *, alpha, n_valid):
    """Single pass: per-sample max + subtract + ReLU; whole sample(s) per block.

    x_ref/o_ref: (tb, R, 128) when the per-sample size is lane-aligned
    (n_valid is None), else (tb, Nb) with Nb = round_up(N, 128) >= N.  In the
    ragged case lanes >= n_valid are boundary padding with undefined contents:
    they are masked out of the max; the writeback of those lanes is clipped by
    Pallas, so the store needs no mask.
    """
    x = x_ref[...]
    if n_valid is not None:
        lane = jax.lax.broadcasted_iota(jnp.int32, x.shape, x.ndim - 1)
        xm = jnp.where(lane < n_valid, x, -jnp.inf)
    else:
        xm = x
    # Reduce the row/sublane axis first: VALU max-accumulate across vregs
    # (4 VALU slots), leaving ONE cross-lane XLU reduce per sample instead of
    # one per (8,128) vreg (v6e/v7x only have 2 XLUs -> would bind the kernel).
    if xm.ndim == 3:
        xm = jnp.max(xm, axis=1, keepdims=True)          # (tb, 1, 128)  VALU
    thr = jnp.max(xm, axis=-1, keepdims=True)            # (tb, 1[, 1])  XLU once/sample
    shift = (jnp.float32(alpha) * thr.astype(jnp.float32)).astype(x.dtype)
    o_ref[...] = jnp.maximum(x - shift, 0).astype(o_ref.dtype)


def _stream_kernel(thr_ref, x_ref, o_ref, *, alpha):
    """Two-pass, pass 2: streaming elementwise relu(x - alpha * thr).

    thr_ref: (tb, 1) f32 per-sample thresholds (tiny, broadcast along lanes).
    x_ref / o_ref: (tb, cb) tiles; boundary blocks are clipped on writeback.
    """
    # TODO(synk): if an xprof trace on v7x shows exposed input DMA here, add
    # pipeline_mode=pl.Buffered(3) to the x BlockSpec (costs 50% more input VMEM).
    x = x_ref[...]
    shift = (jnp.float32(alpha) * thr_ref[...]).astype(x.dtype)   # (tb, 1)
    o_ref[...] = jnp.maximum(x - shift, 0).astype(o_ref.dtype)


def max_thresholding(x: jax.Array, alpha: float = 0.9, *,
                     block_budget_bytes: int = _DEFAULT_BLOCK_BUDGET) -> jax.Array:
    """Applies relu(x - alpha * max over non-batch dims of x). Input >= 2D."""
    if x.ndim < 2:
        raise ValueError("max_thresholding expects an input with a batch dim (ndim >= 2).")
    if not jnp.issubdtype(x.dtype, jnp.floating):
        # torch.sub(x, thr, alpha=0.9) rejects integer tensors as well.
        raise TypeError("max_thresholding only supports floating-point inputs.")

    orig_shape = x.shape
    dtype = x.dtype
    B = orig_shape[0]
    N = math.prod(orig_shape[1:])
    itemsize = jnp.dtype(dtype).itemsize
    elem_bytes = _elem_bytes_for_budget(dtype)

    n_block = _cdiv(N, _LANE) * _LANE            # lane-aligned block width (no host pad!)
    lane_aligned = (n_block == N)
    sample_budget_bytes = n_block * elem_bytes   # budgeting footprint per sample
    sample_store_bytes = n_block * itemsize      # stored footprint per sample

    x2 = x.reshape(B, N)                         # free (contiguous) reshape

    fused = sample_budget_bytes <= block_budget_bytes
    tb = 1
    if fused:
        budget_tb = max(1, min(B, block_budget_bytes // sample_budget_bytes))
        # Aim for >= 4 grid steps when B allows (pipelining + v7x megacore),
        # while keeping each block >= ~0.5 MiB so per-step overhead is noise.
        tb = min(budget_tb, max(1, _cdiv(B, 4)))
        if tb * sample_budget_bytes < _MIN_BLOCK_BYTES:
            tb = min(budget_tb, _cdiv(_MIN_BLOCK_BYTES, sample_budget_bytes))
        tb = max(1, min(tb, B))
        if not lane_aligned and tb < B:
            # 2-D (tb, Nb) blocks: the sublane (batch) tile must be a multiple
            # of 8 or equal to the full batch dim.
            if budget_tb >= _SUBLANE:
                tb = max(_SUBLANE, (tb // _SUBLANE) * _SUBLANE)
                tb = min(tb, (budget_tb // _SUBLANE) * _SUBLANE)
            elif B <= budget_tb:
                tb = B
            else:
                fused = False   # narrow corner: mid-size ragged samples, fall back

    if fused:
        # ---------------- single-pass fused path (2 HBM passes) ----------------
        if lane_aligned:
            R = N // _LANE
            x_view = x2.reshape(B, R, _LANE)         # free reshape; lane-dense slabs
            block = (tb, R, _LANE)
            index_map = lambda i: (i, 0, 0)
            out_shape = jax.ShapeDtypeStruct((B, R, _LANE), dtype)
            n_valid = None
        else:
            x_view = x2                               # (B, N); block lane dim = Nb >= N
            block = (tb, n_block)
            index_map = lambda i: (i, 0)
            out_shape = jax.ShapeDtypeStruct((B, N), dtype)
            n_valid = N
        grid = (pl.cdiv(B, tb),)
        step_bytes = 2 * tb * sample_store_bytes      # in + out per grid step
        out2 = pl.pallas_call(
            functools.partial(_fused_kernel, alpha=float(alpha), n_valid=n_valid),
            out_shape=out_shape,
            grid=grid,
            in_specs=[pl.BlockSpec(block, index_map)],
            out_specs=pl.BlockSpec(block, index_map),
            compiler_params=_compiler_params(step_bytes, ("parallel",)),
            cost_estimate=pl.CostEstimate(
                flops=4 * B * N,
                transcendentals=0,
                bytes_accessed=2 * B * N * itemsize,
            ),
        )(x_view)
        return out2.reshape(orig_shape)

    # ---------- two-pass fallback (huge samples): XLA max + streaming Pallas ----------
    # Pass 1 reads x once: XLA's row reduce on the free (B, N) reshape is already
    # HBM-bound; the fused path above covers everything up to multi-MiB samples.
    thr = jnp.max(x2, axis=1, keepdims=True).astype(jnp.float32)   # (B, 1)

    tb2 = B if B <= _SUBLANE else _SUBLANE
    cb = max(_LANE, (block_budget_bytes // (tb2 * elem_bytes)) // _LANE * _LANE)
    cb = min(cb, n_block)
    grid = (pl.cdiv(B, tb2), pl.cdiv(N, cb))
    step_bytes = 2 * tb2 * cb * itemsize + tb2 * 4
    out2 = pl.pallas_call(
        functools.partial(_stream_kernel, alpha=float(alpha)),
        out_shape=jax.ShapeDtypeStruct((B, N), dtype),
        grid=grid,
        in_specs=[
            pl.BlockSpec((tb2, 1), lambda i, j: (i, 0)),
            pl.BlockSpec((tb2, cb), lambda i, j: (i, j)),
        ],
        out_specs=pl.BlockSpec((tb2, cb), lambda i, j: (i, j)),
        compiler_params=_compiler_params(step_bytes, ("parallel", "parallel")),
        cost_estimate=pl.CostEstimate(
            flops=3 * B * N,
            transcendentals=0,
            bytes_accessed=2 * B * N * itemsize + 4 * B,
        ),
    )(thr, x2)
    return out2.reshape(orig_shape)


def _reference(x: jax.Array, alpha: float = 0.9) -> jax.Array:
    b = x.shape[0]
    thr = jnp.max(x.reshape(b, -1), axis=1).reshape((b,) + (1,) * (x.ndim - 1))
    return jax.nn.relu(x - alpha * thr)


if __name__ == "__main__":
    key = jax.random.PRNGKey(0)
    k1, k2, k3 = jax.random.split(key, 3)

    # 1) Lane-aligned fused path (N = 4*16*16 = 1024).
    x = jax.random.normal(k1, (2, 4, 16, 16), dtype=jnp.float32)
    out = jax.block_until_ready(max_thresholding(x))
    ref = _reference(x)
    assert out.shape == x.shape and out.dtype == x.dtype
    assert jnp.allclose(out, ref, atol=1e-6, rtol=1e-6), "fused (aligned) mismatch"

    # 2) Ragged per-sample size (N = 4*15*15 = 900): no host pad/slice,
    #    in-kernel iota mask handles the lane tail.
    x_odd = jax.random.normal(k2, (2, 4, 15, 15), dtype=jnp.float32)
    out_odd = jax.block_until_ready(max_thresholding(x_odd))
    assert jnp.allclose(out_odd, _reference(x_odd), atol=1e-6, rtol=1e-6), \
        "fused (ragged) mismatch"

    # 3) Force the two-pass (reduce + streaming) path with a tiny block budget.
    out_tp = jax.block_until_ready(max_thresholding(x, block_budget_bytes=2048))
    assert jnp.allclose(out_tp, ref, atol=1e-6, rtol=1e-6), "two-pass (aligned) mismatch"
    out_tpo = jax.block_until_ready(max_thresholding(x_odd, block_budget_bytes=2048))
    assert jnp.allclose(out_tpo, _reference(x_odd), atol=1e-6, rtol=1e-6), \
        "two-pass (ragged) mismatch"

    # 4) bf16 sanity check (tolerance sized for bf16 rounding of the shift).
    xb = jax.random.normal(k3, (2, 4, 16, 16), dtype=jnp.float32).astype(jnp.bfloat16)
    outb = jax.block_until_ready(max_thresholding(xb))
    refb = _reference(xb.astype(jnp.float32))
    assert outb.dtype == jnp.bfloat16
    assert jnp.allclose(outb.astype(jnp.float32), refb, atol=0.1, rtol=0.1), "bf16 mismatch"

    print("KERNEL_OK")
</pallas_src>

<mosaic_0001>
module attributes {stable_mosaic.version = 11 : i64} {
  func.func @_fused_kernel(%arg0: i32, %arg1: memref<2x8x128xf32, #tpu.memory_space<vmem>>, %arg2: memref<2x8x128xf32, #tpu.memory_space<vmem>>) attributes {dimension_semantics = [#tpu.dimension_semantics<parallel>], iteration_bounds = array<i64: 1>, scalar_prefetch = 0 : i64, scratch_operands = 0 : i64, tpu.core_type = #tpu.core_type<tc>, window_params = [{transform_indices = @transform_0, window_bounds = array<i64: 2, 8, 128>}, {transform_indices = @transform_1, window_bounds = array<i64: 2, 8, 128>}]} {
    %c0 = arith.constant 0 : index
    %c0_0 = arith.constant 0 : index
    %c0_1 = arith.constant 0 : index
    %0 = vector.load %arg1[%c0, %c0_0, %c0_1] : memref<2x8x128xf32, #tpu.memory_space<vmem>>, vector<2x8x128xf32>
    %cst = arith.constant dense<0xFF800000> : vector<2x128xf32>
    %1 = vector.multi_reduction <maximumf>, %0, %cst [1] : vector<2x8x128xf32> to vector<2x128xf32>
    %2 = vector.shape_cast %1 : vector<2x128xf32> to vector<2x1x128xf32>
    %cst_2 = arith.constant dense<0xFF800000> : vector<2x1xf32>
    %3 = vector.multi_reduction <maximumf>, %2, %cst_2 [2] : vector<2x1x128xf32> to vector<2x1xf32>
    %4 = vector.shape_cast %3 : vector<2x1xf32> to vector<2x1x1xf32>
    %cst_3 = arith.constant 0.899999976 : f32
    %5 = vector.broadcast %cst_3 : f32 to vector<2x1x1xf32>
    %6 = arith.mulf %5, %4 : vector<2x1x1xf32>
    %7 = vector.broadcast %6 : vector<2x1x1xf32> to vector<2x8x128xf32>
    %8 = arith.subf %0, %7 : vector<2x8x128xf32>
    %cst_4 = arith.constant 0.000000e+00 : f32
    %9 = vector.broadcast %cst_4 : f32 to vector<2x8x128xf32>
    %10 = arith.maximumf %8, %9 : vector<2x8x128xf32>
    %c0_5 = arith.constant 0 : index
    %c0_6 = arith.constant 0 : index
    %c0_7 = arith.constant 0 : index
    %11 = vector.load %arg2[%c0_5, %c0_6, %c0_7] : memref<2x8x128xf32, #tpu.memory_space<vmem>>, vector<2x8x128xf32>
    tpu.vector_store %arg2[%c0_5, %c0_6, %c0_7], %10 {strides = array<i32>} : memref<2x8x128xf32, #tpu.memory_space<vmem>>, vector<2x8x128xf32>,
    return
  }
  func.func @transform_0(%arg0: i32) -> (i32, i32, i32) {
    %c0_i32 = arith.constant 0 : i32
    %c0_i32_0 = arith.constant 0 : i32
    %c0_i32_1 = arith.constant 0 : i32
    return %arg0, %c0_i32, %c0_i32_0 : i32, i32, i32
  }
  func.func @transform_1(%arg0: i32) -> (i32, i32, i32) {
    %c0_i32 = arith.constant 0 : i32
    %c0_i32_0 = arith.constant 0 : i32
    %c0_i32_1 = arith.constant 0 : i32
    return %arg0, %c0_i32, %c0_i32_0 : i32, i32, i32
  }
}

</mosaic_0001>

<bundles_post_ra>
// kernel: tpu_custom_call.1
= control target key start
LH: loop header
LB: loop body
LE: loop exit
PB: predicated region body
PF: predicated region fallthrough
CT: control target
= control target key end

     0   :  { %6 = vsyncpa [#allocation3], 0  ;;  %s152_s0 = inlined_call_operand.hbm [shape: f32[2,8,128], index: 0, kind: input, shape index: {}]   ;;  %s153_s1 = inlined_call_operand.hbm [shape: f32[2,8,128], index: 1, kind: output, shape index: {}]  }
   0x1   :  { %7 = vsyncpa [#allocation4], 0  ;;  %s12_s8 = sshll.u32 %s152_s0, 4  ;;  %s126_s9 = smov [#allocation2]   ;;  %s13_s8 = int_to_ptr.hbm [resolvable:$true] %s12_s8 }
   0x2   :  { %s14_s10 = sshll.u32 %s126_s9, 4  ;;  %s127_s11 = smov 128   ;;  %s15_s10 = int_to_ptr.vmem [resolvable:$true] %s14_s10 }
   0x3   :  { %s128_s12 = smov 8  }
   0x4   :  { %20 = dma.hbm_to_vmem [thread:$0]  %s13_s8, 256, %s15_s10, [#allocation3], %s127_s11, %s127_s11, %s128_s12  }
   0x5   :  { %122 = dma.done.wait [#allocation3], 256  }
   0x6   :  { %123 = vsyncadd [#allocation3], 4294967040  ;;  %v25_v0 = vld [vmem:[#allocation2] sm:$0xff]  ;;  %v26_v1 = vld [vmem:[#allocation2 + $0x8] sm:$0xff]  ;;  %s129_s0 = smov [#allocation5]   ;;  %s57_s16 = sshll.u32 %s153_s1, 4  ;;  %s58_s16 = int_to_ptr.hbm [resolvable:$true] %s57_s16 }
   0x7   :  { %v27_v2 = vrot.slane %v25_v0, 4  ;;  %v33_v3 = vrot.slane %v26_v1, 4  ;;  %s55_s13 = sshll.u32 %s129_s0, 4  ;;  %s56_s13 = int_to_ptr.vmem [resolvable:$true] %s55_s13 }
   0x9   :  { %v28_v4 = vmax.f32 %v25_v0, %v27_v2  ;;  %v34_v5 = vmax.f32 %v26_v1, %v33_v3 }
   0xb   :  { %v29_v6 = vrot.slane %v28_v4, 2  ;;  %v35_v7 = vrot.slane %v34_v5, 2 }
   0xd   :  { %v30_v8 = vmax.f32 %v28_v4, %v29_v6  ;;  %v36_v10 = vmax.f32 %v34_v5, %v35_v7 }
   0xf   :  { %v31_v9 = vrot.slane %v30_v8, 1  ;;  %v37_v12 = vrot.slane %v36_v10, 1 }
  0x11   :  { %v32_v11 = vmax.f32 %v30_v8, %v31_v9  ;;  %v38_v13 = vmax.f32 %v36_v10, %v37_v12 }
  0x13   :  { %39 = vmax.xlane.f32.xlu0 %v32_v11 }
  0x1b   :  { %41 = vmax.xlane.f32.xlu0 %v38_v13 }
  0x86   :  { %v40_v14 = vpop.xlane.xlu0 %39 }
  0x87   :  { %v43_v15 = vmul.f32 0.9, %v40_v14 }
  0x89   :  { %v45_v16 = vsub.f32 %v25_v0, %v43_v15 }
  0x8b   :  { %v47_v17 = vmax.f32 %v45_v16, 0.0 }
  0x8d   :  { %49 = vst [vmem:[#allocation5] sm:$0xff] %v47_v17 }
  0x8e   :  { %v42_v18 = vpop.xlane.xlu0 %41 }
  0x8f   :  { %v44_v19 = vmul.f32 0.9, %v42_v18 }
  0x91   :  { %v46_v20 = vsub.f32 %v26_v1, %v44_v19 }
  0x93   :  { %v48_v21 = vmax.f32 %v46_v20, 0.0 }
  0x95   :  { %50 = vst [vmem:[#allocation5 + $0x8] sm:$0xff] %v48_v21 }
  0x96   :  { %63 = dma.vmem_to_hbm [thread:$0]  %s56_s13, 256, %s58_s16, [#allocation4], %s127_s11, %s127_s11, %s128_s12  }
  0x97   :  { %124 = dma.done.wait [#allocation4], 256  }
  0x98   :  { %125 = vsyncadd [#allocation4], 4294967040 }
  0x99   :  { %68 = vsyncpa [#allocation3], 1 }
  0x9a   :  { %69 = vsyncpa [#allocation4], 1 }

</bundles_post_ra>
